<compile_context>
chip_gen: v6e
topology: v6e:2x2x1
jax: 0.10.0
libtpu: 0.0.40
codegen_flags: <defaults>
</compile_context>

<pallas_src>
import functools
import math

import jax
import jax.numpy as jnp
from jax.experimental import pallas as pl
from jax.experimental.pallas import tpu as pltpu


def _drop_path_kernel(keep_ref, x_ref, o_ref, *, scale):
    """One grid step = one (sample, row-tile) block of shape (TR, C)."""
    b = pl.program_id(0)
    s = keep_ref[b].astype(o_ref.dtype) * jnp.asarray(scale, dtype=o_ref.dtype)
    o_ref[...] = x_ref[...] * s


def _lane_dense_cols(n: int, max_lanes: int = 2048) -> int:
    """Largest multiple-of-128 divisor of n (capped); fall back to full n."""
    if n % 128 != 0:
        return n  # full-extent last dim is always a legal block; stores may mask
    c = 128
    while c * 2 <= max_lanes and n % (c * 2) == 0:
        c *= 2
    return c


def _pick_block_rows(r: int, c: int, itemsize: int, target_bytes: int) -> int:
    """Row-tile targeting ~target_bytes per block; ragged last tile is fine."""
    sub = 16 if itemsize < 4 else 8  # sublane packing for bf16 / fp8
    tr = (target_bytes // max(1, c * itemsize)) // sub * sub
    tr = max(sub, tr)
    return min(tr, r)  # tr == r (full extent) is always legal


def drop_path_pallas(x, key, drop_prob: float = 0.0, training: bool = False,
                     scale_by_keep: bool = True, *,
                     block_target_bytes: int = 4 * 1024 * 1024):
    """Pallas equivalent of timm / Audio-Mamba drop_path on a (B, ...) tensor."""
    if drop_prob == 0.0 or not training:
        return x
    keep_prob = 1.0 - drop_prob
    orig_shape = x.shape
    B = orig_shape[0]
    N = math.prod(orig_shape[1:])

    # Per-sample Bernoulli(keep_prob) mask, drawn once with a proper JAX key.
    # int32 so it can be scalar-prefetched into SMEM and used by the index_map.
    keep = jax.random.bernoulli(key, p=keep_prob, shape=(B,)).astype(jnp.int32)
    scale = (1.0 / keep_prob) if (scale_by_keep and keep_prob > 0.0) else 1.0

    # Lane-dense per-sample view (B, R, C), C a large multiple of 128 if possible.
    C = _lane_dense_cols(N)
    R = N // C
    xv = x.reshape(B, R, C)

    itemsize = jnp.dtype(x.dtype).itemsize
    tr = _pick_block_rows(R, C, itemsize, block_target_bytes)
    grid = (B, pl.cdiv(R, tr))

    def x_index_map(b, l, keep_ref):
        # Dropped samples (keep == 0) are routed to a fixed block so the
        # pipeline dedups consecutive fetches -> their HBM reads are skipped.
        # Correct either way: the kernel multiplies that block by 0.
        k = keep_ref[b]
        return (b * k, l * k, 0)

    def o_index_map(b, l, keep_ref):
        return (b, l, 0)

    out = pl.pallas_call(
        functools.partial(_drop_path_kernel, scale=scale),
        out_shape=jax.ShapeDtypeStruct((B, R, C), x.dtype),
        grid_spec=pltpu.PrefetchScalarGridSpec(
            num_scalar_prefetch=1,
            grid=grid,
            in_specs=[pl.BlockSpec((None, tr, C), x_index_map)],
            out_specs=pl.BlockSpec((None, tr, C), o_index_map),
        ),
        compiler_params=pltpu.CompilerParams(
            dimension_semantics=("parallel", "arbitrary"),
            vmem_limit_bytes=48 * 1024 * 1024),
        cost_estimate=pl.CostEstimate(
            flops=B * N, transcendentals=0,
            bytes_accessed=2 * B * N * itemsize),
    )(keep, xv)
    return out.reshape(orig_shape)


class DropPath:
    """Mirror of the PyTorch DropPath module (no learnable parameters).

    NOTE: callers should pass a distinct seed / key per layer and per step;
    reusing the default seed silently reuses the same drop mask.
    """

    def __init__(self, drop_prob: float = 0.0, scale_by_keep: bool = True):
        self.drop_prob = drop_prob
        self.scale_by_keep = scale_by_keep
        self.training = True

    def __call__(self, x, seed=0):
        key = jax.random.PRNGKey(seed)
        return drop_path_pallas(x, key, self.drop_prob, self.training,
                                self.scale_by_keep)


if __name__ == "__main__":
    key = jax.random.PRNGKey(0)
    B, L, D = 2, 16, 128
    x = jax.random.normal(key, (B, L, D), dtype=jnp.float32)

    # eval / drop_prob==0 path: identity
    mod_eval = DropPath(drop_prob=0.5)
    mod_eval.training = False
    y_eval = jax.block_until_ready(mod_eval(x))
    assert jnp.allclose(y_eval, x)

    # training path: per-sample mask, scaled by 1/keep_prob
    drop_prob = 0.5
    keep_prob = 1.0 - drop_prob
    mod = DropPath(drop_prob=drop_prob, scale_by_keep=True)
    mod.training = True
    y = jax.block_until_ready(mod(x, seed=1234))
    for b in range(B):
        zero_ok = bool(jnp.all(y[b] == 0.0))
        scaled_ok = bool(jnp.allclose(y[b], x[b] / keep_prob, atol=1e-5))
        assert zero_ok or scaled_ok, f"sample {b}: unexpected drop-path output"

    # scale_by_keep=False path: each sample is either all-zero or x unchanged.
    mod2 = DropPath(drop_prob=drop_prob, scale_by_keep=False)
    mod2.training = True
    y2 = jax.block_until_ready(mod2(x, seed=7))
    for b in range(B):
        zero_ok = bool(jnp.all(y2[b] == 0.0))
        same_ok = bool(jnp.allclose(y2[b], x[b], atol=1e-6))
        assert zero_ok or same_ok, f"sample {b}: unexpected drop-path output (no scale)"

    # bf16 path: scale 1/keep_prob = 2.0 is exact in bf16.
    xb = x.astype(jnp.bfloat16)
    yb = jax.block_until_ready(
        drop_path_pallas(xb, jax.random.PRNGKey(11), drop_prob, True, True))
    for b in range(B):
        zero_ok = bool(jnp.all(yb[b] == 0))
        scaled_ok = bool(jnp.all(yb[b] == (xb[b] * jnp.bfloat16(2.0))))
        assert zero_ok or scaled_ok, f"sample {b}: unexpected bf16 drop-path output"

    # Ragged row-tile path (R=9 rows, forced tr=8 -> partial last tile) on a
    # 4-D input to exercise the flatten + pl.cdiv masked-edge handling.
    x4 = jax.random.normal(jax.random.PRNGKey(3), (2, 9, 8, 128), jnp.float32)
    y4 = jax.block_until_ready(
        drop_path_pallas(x4, jax.random.PRNGKey(21), drop_prob, True, True,
                         block_target_bytes=8192))
    for b in range(x4.shape[0]):
        zero_ok = bool(jnp.all(y4[b] == 0.0))
        scaled_ok = bool(jnp.allclose(y4[b], x4[b] / keep_prob, atol=1e-5))
        assert zero_ok or scaled_ok, f"sample {b}: unexpected ragged-tile output"

    print("KERNEL_OK")
</pallas_src>

<mosaic_0001>
module attributes {stable_mosaic.version = 11 : i64} {
  func.func @_drop_path_kernel(%arg0: i32, %arg1: i32, %arg2: memref<2xi32, #tpu.memory_space<smem>>, %arg3: memref<1x1x2048xf32, #tpu.memory_space<vmem>>, %arg4: memref<1x1x2048xf32, #tpu.memory_space<vmem>>) attributes {dimension_semantics = [#tpu.dimension_semantics<parallel>, #tpu.dimension_semantics<arbitrary>], iteration_bounds = array<i64: 2, 1>, scalar_prefetch = 1 : i64, scratch_operands = 0 : i64, tpu.core_type = #tpu.core_type<tc>, window_params = [{transform_indices = @transform_0, window_bounds = array<i64: 1, 1, 2048>}, {transform_indices = @transform_1, window_bounds = array<i64: 1, 1, 2048>}]} {
    %0 = arith.index_cast %arg0 : i32 to index
    %1 = memref.load %arg2[%0] : memref<2xi32, #tpu.memory_space<smem>>
    %2 = arith.sitofp %1 : i32 to f32
    %cst = arith.constant 2.000000e+00 : f32
    %3 = arith.mulf %2, %cst : f32
    %c0 = arith.constant 0 : index
    %c0_0 = arith.constant 0 : index
    %c0_1 = arith.constant 0 : index
    %4 = vector.load %arg3[%c0, %c0_0, %c0_1] : memref<1x1x2048xf32, #tpu.memory_space<vmem>>, vector<1x1x2048xf32>
    %5 = vector.shape_cast %4 : vector<1x1x2048xf32> to vector<1x2048xf32>
    %6 = vector.broadcast %3 : f32 to vector<1x2048xf32>
    %7 = arith.mulf %5, %6 : vector<1x2048xf32>
    %c0_2 = arith.constant 0 : index
    %c0_3 = arith.constant 0 : index
    %c0_4 = arith.constant 0 : index
    %8 = vector.load %arg4[%c0_2, %c0_3, %c0_4] : memref<1x1x2048xf32, #tpu.memory_space<vmem>>, vector<1x1x2048xf32>
    %9 = vector.shape_cast %8 : vector<1x1x2048xf32> to vector<1x2048xf32>
    %10 = vector.shape_cast %7 : vector<1x2048xf32> to vector<1x1x2048xf32>
    tpu.vector_store %arg4[%c0_2, %c0_3, %c0_4], %10 {strides = array<i32>} : memref<1x1x2048xf32, #tpu.memory_space<vmem>>, vector<1x1x2048xf32>,
    return
  }
  func.func @transform_0(%arg0: i32, %arg1: i32, %arg2: memref<2xi32, #tpu.memory_space<smem>>) -> (i32, i32, i32) {
    %0 = arith.index_cast %arg0 : i32 to index
    %1 = memref.load %arg2[%0] : memref<2xi32, #tpu.memory_space<smem>>
    %2 = arith.muli %arg0, %1 : i32
    %3 = arith.muli %arg1, %1 : i32
    %c0_i32 = arith.constant 0 : i32
    %c0_i32_0 = arith.constant 0 : i32
    return %2, %3, %c0_i32 : i32, i32, i32
  }
  func.func @transform_1(%arg0: i32, %arg1: i32, %arg2: memref<2xi32, #tpu.memory_space<smem>>) -> (i32, i32, i32) {
    %c0_i32 = arith.constant 0 : i32
    %c0_i32_0 = arith.constant 0 : i32
    return %arg0, %arg1, %c0_i32 : i32, i32, i32
  }
}

</mosaic_0001>

<bundles_post_ra>
// kernel: tpu_custom_call.1
= control target key start
LH: loop header
LB: loop body
LE: loop exit
PB: predicated region body
PF: predicated region fallthrough
CT: control target
= control target key end

     0   :  { %s531_s9 = smov [#allocation3]   ;;  %s736_s0 = inlined_call_operand.hbm [shape: s32[2], index: 0, kind: input, shape index: {}]   ;;  %s737_s1 = inlined_call_operand.hbm [shape: f32[2,1,2048], index: 1, kind: input, shape index: {}]   ;;  %s738_s2 = inlined_call_operand.hbm [shape: f32[2,1,2048], index: 2, kind: output, shape index: {}]  }
   0x1   :  { %8 = dma.hbm_to_smem %s736_s0, 16, %s531_s9, [#allocation2] }
   0x2   :  { %485 = dma.done.wait [#allocation2], 16 }
   0x3   :  { %486 = vsyncadd [#allocation2], 4294967280 }
   0x4   :  { %10 = sfence }
   0x5   :  { %11 = vsyncpa [#allocation5], 0 }
   0x6   :  { %13 = vsyncpa [#allocation5 + $0x1], 0 }
   0x7   :  { %14 = vsyncpa [#allocation6], 0 }
   0x8   :  { %16 = vsyncpa [#allocation6 + $0x1], 0  ;;  %s552_s12 = smov 0   ;;  %s554_s13 = smov 0  }
   0x9   :  { %s556_s14 = smov 0   ;;  %s558_s15 = smov 0  }
   0xa   :  { %s560_s16 = smov 0   ;;  %s562_s17 = smov 0  }
   0xb   :  { %s564_s0 = smov 0   ;;  %s566_s18 = smov 0  }
   0xc   :  { %s568_s19 = smov 0  }
   0xd LB: > { %s279_s20 = sadd.s32 4294967295, %s529_s19   ;;  %s34_s21 = sadd.s32 1, %s525_s18  ;;  %s529_s19 = sphi %s568_s19, %s22_s19   ;;  %s525_s18 = sphi %s566_s18, %s761_s18   ;;  %s521_s0 = sphi %s564_s0, %s760_s0   ;;  %s517_s17 = sphi %s562_s17, %s759_s17   ;;  %s513_s16 = sphi %s560_s16, %s758_s16   ;;  %s509_s15 = sphi %s558_s15, %s757_s15   ;;  %s505_s14 = sphi %s556_s14, %s756_s14   ;;  %s501_s13 = sphi %s554_s13, %s755_s13   ;;  %s497_s12 = sphi %s552_s12, %s754_s12  }
   0xe   : > { %s38_s22 = sld [smem:[#allocation3 + %s525_s18]]  ;;  %s280_s23 = sadd.s32 4294967294, %s529_s19  }
   0xf   : > { %p36_p0 = scmp.ge.s32.totalorder %s34_s21, 2  ;;  %s49_s24 = sadd.s32 1, %s517_s17 }
  0x10   : > { %p56_p1 = scmp.ne.s32.totalorder %s517_s17, %s513_s16  ;;  %p57_p2 = scmp.eq.s32.totalorder %s529_s19, 0 }
  0x11   : > { %s763_s21 = smov (%p36_p0, %s34_s21), 0  ;;  %p62_p3 = scmp.ne.s32.totalorder %s513_s16, %s509_s15 }
  0x12   : > { %742 = sst [smem:[#allocation13_spill]] %s763_s21  ;;  %p63_p4 = scmp.eq.s32.totalorder %s279_s20, 0 }
  0x13   : > { %s41_s25 = sld [smem:[#allocation3 + %s763_s21]]  ;;  %s72_s27 = ssub.s32 %s525_s18, %s763_s21 }
  0x14   : > { %s39_s26 = smul.u32 %s525_s18, %s38_s22  ;;  %p610_p5 = por %p63_p4, %p62_p3 }
  0x15   : > { %p75_p6 = scmp.eq.s32.totalorder %s72_s27, 0  ;;  %s77_s29 = sadd.s32 1, %s505_s14 }
  0x16   : > { %s743_s28 = scalar_select %p610_p5, 1, 0 }
  0x17   : > { %p87_p7 = scmp.ne.s32.totalorder %s505_s14, %s501_s13  ;;  %p88_p8 = scmp.eq.s32.totalorder %s279_s20, 1 }
  0x18   : > { %s618_s30 = scalar_select %p75_p6, %s505_s14, %s77_s29  }
  0x19   : > { %p93_p9 = scmp.ne.s32.totalorder %s501_s13, %s497_s12  ;;  %s42_s3 = smul.u32 %s41_s25, %s763_s21 }
  0x1a   : > { %p94_p10 = scmp.eq.s32.totalorder %s280_s23, 1  ;;  %p623_p11 = por %p88_p8, %p87_p7 }
  0x1b   : > { %s44_s5 = ssub.s32 %s39_s26, %s42_s3  ;;  %p58_p3 = por %p57_p2, %p56_p1 }
  0x1c   : > { %s744_s4 = scalar_select %p623_p11, 1, 0 }
  0x1d   : > { %p628_p13 = por %p94_p10, %p93_p9  ;;  %p47_p0 = scmp.eq.s32.totalorder %s44_s5, 0 }
  0x1e   : > { %p312_p4 = scmp.lt.s32.totalorder %s529_s19, 2  ;;  %s114_s7 = sand.u32 1, %s517_s17  }
  0x1f   : > { %s745_s6 = scalar_select %p628_p13, 1, 0 }
  0x20   : > { %s640_s8 = scalar_select %p47_p0, %s517_s17, %s49_s24  }
  0x21   : > { %s283_s9 = sshll.u32 %s114_s7, 4  ;;  %p642_p6 = pnand %p312_p4, %p58_p3 }
  0x22   : > { %s296_s11 = scalar_select %p58_p3, [#allocation3], [#allocation8] }
  0x23   : > { %s297_s15 = scalar_select %p58_p3, %s525_s18, 0 }
  0x24   : > { %s765_s11 = smov (!%p312_p4, %s296_s11), [#allocation9]  ;;  %p286_p7 = scmp.ge.s32.totalorder %s529_s19, 1 }
  0x25   : > { %s767_s15 = smov (!%p312_p4, %s297_s15), 0  ;;  %p136_p8 = scmp.lt.s32.totalorder %s529_s19, 3 }
  0x26   : > { %s119_s20 = sld [smem:[%s765_s11 + %s767_s15]]  ;;  %s118_s23 = scalar_lea.vmem [#allocation4], %s283_s9 }
  0x27   : > { %p649_p9 = pnand %p286_p7, %p136_p8  ;;  %s131_s24 = sshll.u32 %s118_s23, 4  ;;  %s654_s24 = int_to_ptr.vmem [resolvable:$true] %s131_s24 }
  0x28   : > { %s115_s5 = scalar_lea.sflag [#allocation5], %s114_s7  ;;  %p397_p2 = pneg %p642_p6 }
  0x29   : > { %s747_s22 = scalar_select %p649_p9, 1, 0 }
  0x2a   : > { %s400_s9 = scalar_lea.hbm %s737_s1, 512 }
  0x2c   : > { %s120_s25 = smul.u32 %s525_s18, %s119_s20 }
  0x2e   : > { %s294_s26 = sshll.u32 %s120_s25, 8 }
  0x2f   : > { %s129_s3 = scalar_lea.hbm %s737_s1, %s294_s26 }
  0x30   : > { %s395_s21 = scalar_lea.hbm %s129_s3, 256  ;;  %p401_p3 = scmp.lt.s32.totalorder %s129_s3, %s737_s1 }
  0x31   : > { %p396_p1 = scmp.ne.s32.totalorder %s129_s3, %s395_s21  ;;  %p402_p4 = scmp.lt.s32.totalorder %s400_s9, %s395_s21 }
  0x33   : > { %p398_p10 = pnand %p397_p2, %p396_p1  ;;  %p403_p7 = por %p402_p4, %p401_p3 }
  0x35   : > { %p399_p0 = pneg %p398_p10 }
  0x37   : > { %p404_p8 = pnand %p403_p7, %p399_p0 }
  0x39   : > { %407 = shalt.err (!%p404_p8)
}
  0x3a   : > { %s408_s7 = scalar_lea.vmem %s654_s24, 256  ;;  %s532_s25 = smov [#allocation4]  }
  0x3b   : > { %p409_p12 = scmp.ne.s32.totalorder %s654_s24, %s408_s7  ;;  %s413_s26 = sshll.u32 %s532_s25, 4  ;;  %s414_s26 = int_to_ptr.vmem [resolvable:$false] %s413_s26 }
  0x3c   : > { %s415_s27 = scalar_lea.vmem %s414_s26, 512  ;;  %p416_p10 = scmp.lt.s32.totalorder %s654_s24, %s414_s26 }
  0x3d   : > { %p411_p13 = pnand %p409_p12, %p397_p2  ;;  %p417_p11 = scmp.lt.s32.totalorder %s415_s27, %s408_s7 }
  0x3f   : > { %p412_p1 = pneg %p411_p13  ;;  %p418_p5 = por %p417_p11, %p416_p10 }
  0x41   : > { %p419_p9 = pnand %p418_p5, %p412_p1 }
  0x43   : > { %422 = shalt.err (!%p419_p9)
}
  0x44   : > { %307 = dma.hbm_to_vmem [thread:$0]  (!%p642_p6), %s129_s3, 256, %s654_s24, %s115_s5  }
  0x45   : > { %p748_p0 = scmp.ne.s32.totalorder %s747_s22, 0 }
  0x46   : > { %s142_s21 = sand.u32 (!%p748_p0), 1, %s513_s16   ;;  %p749_p12 = scmp.ne.s32.totalorder (!%p748_p0), %s743_s28, 0 }
  0x47   : > { %140 = sbr.rel (%p748_p0) target bundleno = 104 (0x68), region = 24  ;;  %s287_s29 = sshll.u32 (!%p748_p0), %s142_s21, 4 }
  0x48   : > { %s143_s11 = scalar_lea.sflag (!%p748_p0), [#allocation5], %s142_s21  ;;  %s146_s15 = scalar_lea.vmem (!%p748_p0), [#allocation4], %s287_s29 }
  0x4c   : > { %488 = dma.done.wait (%p749_p12), %s143_s11, 256  }
  0x4d   : > { %490 = vsyncadd (%p749_p12), %s143_s11, 4294967040  ;;  %s162_s10 = sand.u32 1, %s501_s13   ;;  %s168_s9 = sld [smem:[#allocation3 + %s521_s0]]  ;;  %v171_v0 = vld [vmem:[%s146_s15] sm:$0xff]  ;;  %v172_v1 = vld [vmem:[%s146_s15 + $0x8] sm:$0xff] }
  0x4e   : > { %s288_s24 = sshll.u32 %s162_s10, 4  ;;  %s295_s22 = sshll.u32 %s521_s0, 8 }
  0x4f   : > { %s164_s23 = scalar_lea.vmem [#allocation7], %s288_s24  ;;  %s193_s25 = scalar_lea.hbm %s738_s2, %s295_s22 }
  0x50   : > { %s195_s20 = sshll.u32 %s164_s23, 4  ;;  %s179_s0 = scalar_lea.sflag [#allocation6], %s162_s10  ;;  %s683_s20 = int_to_ptr.vmem [resolvable:$true] %s195_s20 }
  0x51   : > { %s423_s26 = scalar_lea.vmem %s683_s20, 256  ;;  %p750_p11 = scmp.ne.s32.totalorder %s744_s4, 0 }
  0x52   : > { %p424_p5 = scmp.ne.s32.totalorder %s683_s20, %s423_s26  ;;  %s533_s27 = smov [#allocation7]  }
  0x53   : > { %s169_s3 = scvt.s32.f32 %s168_s9  ;;  %s427_s21 = sshll.u32 %s533_s27, 4  ;;  %s428_s21 = int_to_ptr.vmem [resolvable:$false] %s427_s21 }
  0x54   : > { %p425_p13 = pnand %p424_p5, %p750_p11  ;;  %s429_s29 = scalar_lea.vmem %s428_s21, 512 }
  0x55   : > { %s170_s5 = smul.f32 2.0, %s169_s3  ;;  %p430_p9 = scmp.lt.s32.totalorder %s683_s20, %s428_s21 }
  0x56   : > { %p426_p6 = pneg %p425_p13  ;;  %p431_p2 = scmp.lt.s32.totalorder %s429_s29, %s423_s26 }
  0x57   : > { %v173_v2 = vstv %s170_s5 }
  0x58   : > { %v174_v3 = vmul.f32 %v173_v2, %v171_v0  ;;  %v175_v4 = vmul.f32 %v173_v2, %v172_v1  ;;  %p432_p3 = por %p431_p2, %p430_p9 }
  0x5a   : > { %176 = vst [vmem:[%s164_s23] sm:$0xff] %v174_v3  ;;  %177 = vst [vmem:[%s164_s23 + $0x8] sm:$0xff] %v175_v4  ;;  %p433_p4 = pnand %p432_p3, %p426_p6 }
  0x5c   : > { %436 = shalt.err (!%p433_p4)
}
  0x5d   : > { %s437_s11 = scalar_lea.hbm %s193_s25, 256  ;;  %s441_s9 = scalar_lea.hbm %s738_s2, 512 }
  0x5e   : > { %p438_p7 = scmp.ne.s32.totalorder %s193_s25, %s437_s11  ;;  %p442_p10 = scmp.lt.s32.totalorder %s193_s25, %s738_s2 }
  0x5f   : > { %p443_p0 = scmp.lt.s32.totalorder %s441_s9, %s437_s11 }
  0x60   : > { %p439_p8 = pnand %p438_p7, %p750_p11 }
  0x61   : > { %p444_p12 = por %p443_p0, %p442_p10 }
  0x62   : > { %p440_p1 = pneg %p439_p8 }
  0x64   : > { %p445_p5 = pnand %p444_p12, %p440_p1 }
  0x66   : > { %448 = shalt.err (!%p445_p5)
}
  0x67   : > { %300 = dma.vmem_to_hbm [thread:$0]  (%p750_p11), %s683_s20, 256, %s193_s25, %s179_s0  }
  0x68 PF: > { %s207_s22 = sand.u32 1, %s497_s12   ;;  %p751_p13 = scmp.ne.s32.totalorder %s745_s6, 0 }
  0x69   : > { %p752_p6 = scmp.ge.s32.totalorder %s529_s19, 2  ;;  %s208_s5 = scalar_lea.sflag [#allocation6], %s207_s22 }
  0x6b   : > { %p309_p9 = pnand %p752_p6, %p751_p13 }
  0x6d   : > { %p310_p2 = pneg %p309_p9 }
  0x6f   : > { %492 = dma.done.wait (%p310_p2), %s208_s5, 256  }
  0x70   : > { %494 = vsyncadd (%p310_p2), %s208_s5, 4294967040  ;;  %s22_s19 = sadd.s32 1, %s529_s19   ;;  %s753_s4 = sld [smem:[#allocation13_spill]] }
  0x71   : > { %p19_p3 = scmp.ge.s32.totalorder %s22_s19, 4   ;;  %s754_s12 = smov %s501_s13 }
  0x72   : > { %s755_s13 = smov %s505_s14  ;;  %s756_s14 = smov %s618_s30 }
  0x73   : > { %s757_s15 = smov %s513_s16  ;;  %s758_s16 = smov %s517_s17 }
  0x74   : > { %s759_s17 = smov %s640_s8  ;;  %s760_s0 = smov %s525_s18 }
  0x75   :  { %21 = sbr.rel (!%p19_p3) target bundleno = 13 (0xd), region = 69 }
  0x76   : > { %s761_s18 = smov %s753_s4 }
  0x7a   :  { %213 = vsyncpa [#allocation5], 1 }
  0x7b   :  { %215 = vsyncpa [#allocation5 + $0x1], 1 }
  0x7c   :  { %216 = vsyncpa [#allocation6], 1 }
  0x7d   :  { %218 = vsyncpa [#allocation6 + $0x1], 1 }

</bundles_post_ra>
